<compile_context>
chip_gen: v5e
topology: v5e:2x2
jax: 0.10.0
libtpu: 0.0.40
codegen_flags: <defaults>
</compile_context>

<pallas_src>
import functools

import jax
import jax.numpy as jnp
from jax import lax
from jax.experimental import pallas as pl
from jax.experimental.pallas import tpu as pltpu


def _qkt_kernel(q_ref, k_ref, m_ref, o_ref, *, packed):
    # q_ref: (1, T, TQ, D)   k_ref: (1, T, S, D)   m_ref: (1, TM, TQ, S)
    # o_ref: (1, T, TQ, S)   standard layout
    #        (1, TQ, T*S)    lane-dense packed layout (S < 128, T*S % 128 == 0)
    q = q_ref[0]                                   # (T, TQ, D)
    k = k_ref[0]                                   # (T, S,  D)
    # Batched q @ k^T on the MXU, contracting D directly (no explicit k.T).
    scores = lax.dot_general(
        q, k,
        dimension_numbers=(((2,), (2,)), ((0,), (0,))),
        preferred_element_type=jnp.float32,
    )                                              # (T, TQ, S) f32
    m = m_ref[0].astype(jnp.float32)               # (TM, TQ, S); TM == 1 broadcasts
    scores = scores + m
    if packed:
        t = scores.shape[0]
        # Lane-concat the per-head (TQ, S) slabs into one (TQ, T*S) block so the
        # store path uses full-width vst instead of masked partial stores.
        packed_scores = jnp.concatenate([scores[i] for i in range(t)], axis=-1)
        o_ref[0] = packed_scores.astype(o_ref.dtype)
    else:
        o_ref[0] = scores.astype(o_ref.dtype)


def _divisors_desc(n):
    return sorted((d for d in range(1, n + 1) if n % d == 0), reverse=True)


def _vmem_plan():
    """Per-generation (vmem_limit_bytes or None, tile budget, #TC per chip, physical VMEM)."""
    kind = ""
    try:
        kind = (jax.devices()[0].device_kind or "").lower()
    except Exception:
        pass
    MiB = 1 << 20
    if "v7" in kind:
        # v7x: only 64 MiB VMEM per TensorCore, 2 TensorCores per chip.
        return 56 * MiB, 44 * MiB, 2, 64 * MiB
    if "v6" in kind:
        # v6e: 128 MiB physical, default scoped limit is only 32 MiB.
        return 96 * MiB, 80 * MiB, 1, 128 * MiB
    if "v5" in kind or "v4" in kind:
        # v5e: lowest HBM BW; large blocks minimise redundant mask DMA + step count.
        return 64 * MiB, 52 * MiB, 1, 128 * MiB
    if "v2" in kind or "v3" in kind:
        return None, 12 * MiB, 1, 16 * MiB
    # Unknown / future chip: assume the tighter v7x-style envelope.
    return 56 * MiB, 44 * MiB, 2, 64 * MiB


def _choose_tiles(B, GH, S, D, q_bytes, m_bytes, o_bytes, *,
                  mask_per_head, budget, sublane, min_grid_steps):
    """Pick (heads-per-step T, query-seq tile TQ) under a double-buffered VMEM budget."""

    def step_bytes(T, TQ):
        tm = T if mask_per_head else 1
        qb = T * TQ * D * q_bytes
        kb = T * S * D * q_bytes
        mb = tm * TQ * S * m_bytes
        ob = T * TQ * S * o_bytes
        return 2 * (qb + kb + mb + ob)             # 2x: pipeline double-buffering

    # Query tile: prefer the full sequence (fills the MXU M dim, keeps K blocks
    # resident over fewer steps); otherwise the largest divisor of S aligned to
    # the dtype's sublane packing (8 rows f32, 16 bf16, 32 int8/fp8).
    tq_cands = [S] + [d for d in _divisors_desc(S) if d < S and d % sublane == 0]
    TQ = tq_cands[-1]
    for cand in tq_cands:
        if step_bytes(1, cand) <= budget:
            TQ = cand
            break

    # Heads per step: largest divisor of GH that fits.  When S < 128, prefer a
    # T that makes T*S a multiple of 128 (lane-dense packed output) as long as
    # that does not shrink the head block by more than 4x.
    fitting = [d for d in _divisors_desc(GH) if step_bytes(d, TQ) <= budget]
    T = fitting[0] if fitting else 1
    if S % 128 != 0:
        packable = [d for d in fitting if (d * S) % 128 == 0]
        if packable and packable[0] * 4 >= T:
            T = packable[0]

    # v7x: make sure both TensorCores get at least one grid step.
    if min_grid_steps > 1 and B * (GH // T) * (S // TQ) < min_grid_steps:
        t_opts = [d for d in _divisors_desc(GH) if GH // d >= min_grid_steps]
        if t_opts:
            T = t_opts[0]
        else:
            tq_opts = [d for d in tq_cands if d < S and S // d >= min_grid_steps]
            if tq_opts:
                TQ = tq_opts[0]

    return T, TQ, step_bytes(T, TQ)


def qkt(q, k, attn_mask):
    """q, k: [B, G, H, S, D]; attn_mask: [B, 1, 1, S, S] -> attn: [B, G, H, S, S]."""
    B, G, H, S, D = q.shape
    assert k.shape == (B, G, H, S, D)
    assert attn_mask.shape == (B, 1, 1, S, S)

    GH = G * H
    out_dtype = q.dtype
    q_bytes = jnp.dtype(q.dtype).itemsize
    m_bytes = jnp.dtype(attn_mask.dtype).itemsize
    o_bytes = jnp.dtype(out_dtype).itemsize

    vmem_limit, budget, n_tc, vmem_phys = _vmem_plan()
    sublane = max(8, 32 // q_bytes)                # 8 rows f32, 16 bf16, 32 int8/fp8

    # Tiny problems (like the per-op benchmark shape) are pure per-step
    # overhead: fold the batch dim into the dot batch dim so the whole op can
    # run as a single grid step (the mask becomes per-head).
    out_total_bytes = B * GH * S * S * o_bytes
    fold_batch = B > 1 and out_total_bytes <= (1 << 20)
    if fold_batch:
        Bp, GHp = 1, B * GH
        q_f = q.reshape(Bp, GHp, S, D)
        k_f = k.reshape(Bp, GHp, S, D)
        m_f = jnp.broadcast_to(
            attn_mask.reshape(B, 1, S, S), (B, GH, S, S)).reshape(Bp, GHp, S, S)
        mask_per_head = True
    else:
        Bp, GHp = B, GH
        q_f = q.reshape(Bp, GHp, S, D)
        k_f = k.reshape(Bp, GHp, S, D)
        m_f = attn_mask.reshape(B, 1, S, S)
        mask_per_head = False

    T, TQ, blk_bytes = _choose_tiles(
        Bp, GHp, S, D, q_bytes, m_bytes, o_bytes,
        mask_per_head=mask_per_head, budget=budget,
        sublane=sublane, min_grid_steps=n_tc)

    TM = T if mask_per_head else 1
    n_hblk = GHp // T
    n_qblk = S // TQ

    # Lane-dense packed output when S alone is not lane-dense but T*S is.
    packed = (S % 128 != 0) and ((T * S) % 128 == 0)

    # Explicit scoped-VMEM limit; raised further if nothing fit the budget
    # (e.g. prime S) so the chosen blocks are still guaranteed to compile.
    compiler_kwargs = {}
    if vmem_limit is not None:
        limit = max(vmem_limit, min(blk_bytes + (8 << 20), vmem_phys))
        compiler_kwargs["vmem_limit_bytes"] = int(min(limit, vmem_phys))

    # Grid order: put on the inner axis whichever reusable block (K vs mask)
    # saves the most redundant HBM traffic when held constant across steps.
    inner_heads = False
    if n_hblk > 1 and n_qblk > 1 and not mask_per_head:
        k_blk_bytes = T * S * D * q_bytes
        m_blk_bytes = TQ * S * m_bytes
        inner_heads = m_blk_bytes > k_blk_bytes

    if inner_heads:
        grid = (Bp, n_qblk, n_hblk)

        def amap(fn):
            return lambda b, qi, h: fn(b, h, qi)
    else:
        grid = (Bp, n_hblk, n_qblk)

        def amap(fn):
            return lambda b, h, qi: fn(b, h, qi)

    q_spec = pl.BlockSpec((1, T, TQ, D), amap(lambda b, h, qi: (b, h, qi, 0)))
    k_spec = pl.BlockSpec((1, T, S, D), amap(lambda b, h, qi: (b, h, 0, 0)))
    if mask_per_head:
        m_spec = pl.BlockSpec((1, TM, TQ, S), amap(lambda b, h, qi: (b, h, qi, 0)))
    else:
        m_spec = pl.BlockSpec((1, 1, TQ, S), amap(lambda b, h, qi: (b, 0, qi, 0)))

    if packed:
        out_shape = jax.ShapeDtypeStruct((Bp, S, GHp * S), out_dtype)
        o_spec = pl.BlockSpec((1, TQ, T * S), amap(lambda b, h, qi: (b, qi, h)))
    else:
        out_shape = jax.ShapeDtypeStruct((Bp, GHp, S, S), out_dtype)
        o_spec = pl.BlockSpec((1, T, TQ, S), amap(lambda b, h, qi: (b, h, qi, 0)))

    out_f = pl.pallas_call(
        functools.partial(_qkt_kernel, packed=packed),
        out_shape=out_shape,
        grid_spec=pltpu.PrefetchScalarGridSpec(
            num_scalar_prefetch=0,
            grid=grid,
            in_specs=[q_spec, k_spec, m_spec],
            out_specs=o_spec,
        ),
        compiler_params=pltpu.CompilerParams(
            dimension_semantics=("parallel",) * len(grid),
            **compiler_kwargs,
        ),
    )(q_f, k_f, m_f)

    if packed:
        # Undo the lane-dense packing: (B', S, GH'*S) -> (B', GH', S, S).
        out_f = out_f.reshape(Bp, S, GHp, S).transpose(0, 2, 1, 3)
    return out_f.reshape(B, G, H, S, S)


if __name__ == "__main__":
    base_key = jax.random.PRNGKey(0)

    def _run_case(B, G, H, S, D):
        kq, kk, km = jax.random.split(jax.random.fold_in(base_key, B * 1000 + S), 3)
        q = jax.random.normal(kq, (B, G, H, S, D), dtype=jnp.float32)
        k = jax.random.normal(kk, (B, G, H, S, D), dtype=jnp.float32)
        attn_mask = jax.random.normal(km, (B, 1, 1, S, S), dtype=jnp.float32)

        attn = jax.block_until_ready(qkt(q, k, attn_mask))

        ref = jnp.einsum("bghsd,bghtd->bghst", q, k) + attn_mask
        assert attn.shape == (B, G, H, S, S)
        assert jnp.allclose(attn, ref, atol=1e-4, rtol=1e-4), \
            f"mismatch for shape {(B, G, H, S, D)}"

    # Benchmark shape implied by the module: batch=2, group=1, heads=4,
    # max_len=8, head_size=32.  (Folds to a single grid step.)
    _run_case(2, 1, 4, 8, 32)
    # Exercise the lane-dense packed-output path (S < 128, T*S % 128 == 0).
    _run_case(1, 1, 4, 64, 32)

    print("KERNEL_OK")
</pallas_src>

<mosaic_0001>
module attributes {stable_mosaic.version = 11 : i64} {
  func.func @_qkt_kernel(%arg0: i32, %arg1: i32, %arg2: i32, %arg3: memref<1x4x8x32xf32, #tpu.memory_space<vmem>>, %arg4: memref<1x4x8x32xf32, #tpu.memory_space<vmem>>, %arg5: memref<1x4x8x8xf32, #tpu.memory_space<vmem>>, %arg6: memref<1x4x8x8xf32, #tpu.memory_space<vmem>>) attributes {dimension_semantics = [#tpu.dimension_semantics<parallel>, #tpu.dimension_semantics<parallel>, #tpu.dimension_semantics<parallel>], iteration_bounds = array<i64: 1, 2, 1>, scalar_prefetch = 0 : i64, scratch_operands = 0 : i64, tpu.core_type = #tpu.core_type<tc>, window_params = [{transform_indices = @transform_0, window_bounds = array<i64: 1, 4, 8, 32>}, {transform_indices = @transform_1, window_bounds = array<i64: 1, 4, 8, 32>}, {transform_indices = @transform_2, window_bounds = array<i64: 1, 4, 8, 8>}, {transform_indices = @transform_3, window_bounds = array<i64: 1, 4, 8, 8>}]} {
    %c0 = arith.constant 0 : index
    %c0_0 = arith.constant 0 : index
    %c0_1 = arith.constant 0 : index
    %c0_2 = arith.constant 0 : index
    %0 = vector.load %arg3[%c0, %c0_0, %c0_1, %c0_2] : memref<1x4x8x32xf32, #tpu.memory_space<vmem>>, vector<1x4x8x32xf32>
    %1 = vector.shape_cast %0 : vector<1x4x8x32xf32> to vector<4x8x32xf32>
    %c0_3 = arith.constant 0 : index
    %c0_4 = arith.constant 0 : index
    %c0_5 = arith.constant 0 : index
    %c0_6 = arith.constant 0 : index
    %2 = vector.load %arg4[%c0_3, %c0_4, %c0_5, %c0_6] : memref<1x4x8x32xf32, #tpu.memory_space<vmem>>, vector<1x4x8x32xf32>
    %3 = vector.shape_cast %2 : vector<1x4x8x32xf32> to vector<4x8x32xf32>
    %cst = arith.constant dense<0.000000e+00> : vector<4x8x8xf32>
    %4 = tpu.matmul %1, %3, %cst {dimension_numbers = #tpu.dot_dimension_numbers<[2], [2], [1], [1], [0, 0, 0, 1, 1, 1], [0], [0]>} : vector<4x8x32xf32>, vector<4x8x32xf32>, vector<4x8x8xf32> -> vector<4x8x8xf32>
    %c0_7 = arith.constant 0 : index
    %c0_8 = arith.constant 0 : index
    %c0_9 = arith.constant 0 : index
    %c0_10 = arith.constant 0 : index
    %5 = vector.load %arg5[%c0_7, %c0_8, %c0_9, %c0_10] : memref<1x4x8x8xf32, #tpu.memory_space<vmem>>, vector<1x4x8x8xf32>
    %6 = vector.shape_cast %5 : vector<1x4x8x8xf32> to vector<4x8x8xf32>
    %7 = arith.addf %4, %6 : vector<4x8x8xf32>
    %c0_11 = arith.constant 0 : index
    %c0_12 = arith.constant 0 : index
    %c0_13 = arith.constant 0 : index
    %c0_14 = arith.constant 0 : index
    %8 = vector.load %arg6[%c0_11, %c0_12, %c0_13, %c0_14] : memref<1x4x8x8xf32, #tpu.memory_space<vmem>>, vector<1x4x8x8xf32>
    %9 = vector.shape_cast %8 : vector<1x4x8x8xf32> to vector<4x8x8xf32>
    %10 = vector.shape_cast %7 : vector<4x8x8xf32> to vector<1x4x8x8xf32>
    tpu.vector_store %arg6[%c0_11, %c0_12, %c0_13, %c0_14], %10 {strides = array<i32>} : memref<1x4x8x8xf32, #tpu.memory_space<vmem>>, vector<1x4x8x8xf32>,
    return
  }
  func.func @transform_0(%arg0: i32, %arg1: i32, %arg2: i32) -> (i32, i32, i32, i32) {
    %c0_i32 = arith.constant 0 : i32
    %c0_i32_0 = arith.constant 0 : i32
    return %arg0, %arg1, %arg2, %c0_i32 : i32, i32, i32, i32
  }
  func.func @transform_1(%arg0: i32, %arg1: i32, %arg2: i32) -> (i32, i32, i32, i32) {
    %c0_i32 = arith.constant 0 : i32
    %c0_i32_0 = arith.constant 0 : i32
    %c0_i32_1 = arith.constant 0 : i32
    return %arg0, %arg1, %c0_i32, %c0_i32_0 : i32, i32, i32, i32
  }
  func.func @transform_2(%arg0: i32, %arg1: i32, %arg2: i32) -> (i32, i32, i32, i32) {
    %c0_i32 = arith.constant 0 : i32
    %c0_i32_0 = arith.constant 0 : i32
    return %arg0, %arg1, %arg2, %c0_i32 : i32, i32, i32, i32
  }
  func.func @transform_3(%arg0: i32, %arg1: i32, %arg2: i32) -> (i32, i32, i32, i32) {
    %c0_i32 = arith.constant 0 : i32
    %c0_i32_0 = arith.constant 0 : i32
    return %arg0, %arg1, %arg2, %c0_i32 : i32, i32, i32, i32
  }
}

</mosaic_0001>

<bundles_post_ra>
// kernel: tpu_custom_call.1
= control target key start
LH: loop header
LB: loop body
LE: loop exit
PB: predicated region body
PF: predicated region fallthrough
CT: control target
= control target key end

     0   :  { %s1088_s0 = inlined_call_operand.hbm [shape: f32[1,8,8,32], index: 0, kind: input, shape index: {}]   ;;  %s1089_s1 = inlined_call_operand.hbm [shape: f32[1,8,8,32], index: 1, kind: input, shape index: {}]   ;;  %s1090_s2 = inlined_call_operand.hbm [shape: f32[1,8,8,8], index: 2, kind: input, shape index: {}]   ;;  %s1091_s3 = inlined_call_operand.hbm [shape: f32[1,8,8,8], index: 3, kind: output, shape index: {}]  }
   0x1   :  { %1097 = sst [smem:[#allocation17_spill]] %s1089_s1 }
   0x2   :  { %8 = vsyncpa [#allocation3], 0 }
   0x3   :  { %10 = vsyncpa [#allocation3 + $0x1], 0 }
   0x4   :  { %11 = vsyncpa [#allocation6], 0 }
   0x5   :  { %13 = vsyncpa [#allocation6 + $0x1], 0 }
   0x6   :  { %14 = vsyncpa [#allocation4], 0 }
   0x7   :  { %16 = vsyncpa [#allocation4 + $0x1], 0  ;;  %s913_s12 = smov 0   ;;  %s915_s13 = smov 0  }
   0x8   :  { %s917_s14 = smov 0   ;;  %s919_s15 = smov 0  }
   0x9   :  { %s921_s16 = smov 0   ;;  %s923_s17 = smov 0  }
   0xa LB: > { %1098 = sst [smem:[#allocation12_spill]] %s875_s14  ;;  %s944_s18 = sadd.s32 4294967295, %s887_s17   ;;  %s887_s17 = sphi %s923_s17, %s22_s17   ;;  %s883_s16 = sphi %s921_s16, %s1114_s16   ;;  %s879_s15 = sphi %s919_s15, %s1113_s15   ;;  %s875_s14 = sphi %s917_s14, %s1117_s14   ;;  %s871_s13 = sphi %s915_s13, %s1116_s13   ;;  %s867_s12 = sphi %s913_s12, %s1115_s12  }
   0xb   : > { %1099 = sst [smem:[#allocation13_spill]] %s883_s16  ;;  %s601_s19 = sadd.s32 4294967294, %s887_s17  }
   0xc   : > { %1100 = sst [smem:[#allocation14_spill]] %s887_s17  ;;  %s37_s20 = sadd.s32 1, %s883_s16 }
   0xd   : > { %s52_s21 = sadd.s32 1, %s875_s14  ;;  %p39_p0 = scmp.ge.s32.totalorder %s37_s20, 2 }
   0xe   : > { %p59_p1 = scmp.ne.s32.totalorder %s875_s14, %s871_s13  ;;  %p60_p2 = scmp.eq.s32.totalorder %s887_s17, 0 }
   0xf   : > { %p65_p3 = scmp.ne.s32.totalorder %s871_s13, %s867_s12  ;;  %s1119_s20 = smov (%p39_p0, %s37_s20), 0 }
  0x10   : > { %1101 = sst [smem:[#allocation15_spill]] %s1119_s20  ;;  %p956_p4 = por %p60_p2, %p59_p1 }
  0x11   : > { %p66_p5 = scmp.eq.s32.totalorder %s944_s18, 0  ;;  %s46_s23 = ssub.s32 %s883_s16, %s1119_s20 }
  0x12   : > { %p151_p6 = scmp.eq.s32.totalorder %s944_s18, 1  ;;  %p50_p7 = scmp.eq.s32.totalorder %s46_s23, 0 }
  0x13   : > { %p964_p8 = por %p66_p5, %p65_p3  ;;  %p157_p10 = scmp.eq.s32.totalorder %s601_s19, 1 }
  0x14   : > { %p968_p9 = por %p151_p6, %p59_p1  ;;  %p603_p12 = scmp.ge.s32.totalorder %s887_s17, 2 }
  0x15   : > { %s973_s26 = scalar_select %p50_p7, %s875_s14, %s52_s21  }
  0x16   : > { %p975_p11 = por %p157_p10, %p65_p3  ;;  %p657_p13 = scmp.lt.s32.totalorder %s887_s17, 2 }
  0x17   : > { %1105 = sst [smem:[#allocation16_spill]] %s973_s26  ;;  %s177_s28 = sand.u32 1, %s875_s14  }
  0x18   : > { %s982_s29 = sshll.u32 %s177_s28, 5  ;;  %s631_s30 = sshll.u32 %s883_s16, 5 }
  0x19   : > { %p987_p0 = pnand %p657_p13, %p956_p4  ;;  %s202_s5 = sand.u32 1, %s887_s17  }
  0x1a   : > { %s1108_s1 = sld [smem:[#allocation17_spill]]  ;;  %s206_s10 = scalar_lea.vmem [#allocation5], %s982_s29 }
  0x1b   : > { %s216_s11 = sshll.u32 %s206_s10, 4  ;;  %s203_s19 = scalar_lea.sflag [#allocation6], %s202_s5  ;;  %s217_s11 = int_to_ptr.vmem [resolvable:$true] %s216_s11 }
  0x1c   : > { %s889_s21 = smov 128   ;;  %s890_s22 = smov 8  }
  0x1d   : > { %p613_p1 = scmp.ge.s32.totalorder %s887_s17, 1  ;;  %p249_p2 = scmp.lt.s32.totalorder %s887_s17, 3 }
  0x1e   : > { %s178_s5 = scalar_lea.sflag [#allocation3], %s177_s28  ;;  %s238_s16 = scalar_lea.hbm %s1090_s2, %s631_s30 }
  0x1f   : > { %p1000_p3 = pnand %p613_p1, %p249_p2  ;;  %s239_s26 = sshll.u32 %s238_s16, 4  ;;  %s240_s26 = int_to_ptr.hbm [resolvable:$true] %s239_s26 }
  0x20   : > { %s213_s8 = scalar_lea.hbm %s1108_s1, %s631_s30  ;;  %s181_s1 = scalar_lea.vmem [#allocation2], %s982_s29 }
  0x21   : > { %s214_s9 = sshll.u32 %s213_s8, 4  ;;  %s189_s8 = scalar_lea.hbm %s1088_s0, %s631_s30  ;;  %s215_s9 = int_to_ptr.hbm [resolvable:$true] %s214_s9 }
  0x22   : > { %649 = dma.hbm_to_vmem [thread:$0]  (!%p987_p0), %s215_s9, 512, %s217_s11, %s203_s19, %s889_s21, %s889_s21, %s890_s22  }
  0x23   : > { %s190_s10 = sshll.u32 %s189_s8, 4  ;;  %s192_s20 = sshll.u32 %s181_s1, 4  ;;  %s191_s10 = int_to_ptr.hbm [resolvable:$true] %s190_s10  ;;  %s193_s20 = int_to_ptr.vmem [resolvable:$true] %s192_s20 }
  0x24   : > { %646 = dma.hbm_to_vmem [thread:$0]  (!%p987_p0), %s191_s10, 512, %s193_s20, %s178_s5, %s889_s21, %s889_s21, %s890_s22  }
  0x25   : > { %s230_s14 = scalar_lea.vmem [#allocation7], %s982_s29  ;;  %253 = sbr.rel (%p1000_p3) target bundleno = 189 (0xbd), region = 32 }
  0x26   : > { %s241_s17 = sshll.u32 %s230_s14, 4  ;;  %s1019_s1 = sand.u32 (!%p1000_p3), 1, %s871_s13   ;;  %s242_s17 = int_to_ptr.vmem [resolvable:$true] %s241_s17 }
  0x27   : > { %652 = dma.hbm_to_vmem [thread:$0]  (!%p987_p0), %s240_s26, 512, %s242_s17, %s203_s19, %s889_s21, %s889_s21, %s890_s22  }
  0x28   : > { %s1022_s20 = sshll.u32 (!%p1000_p3), %s1019_s1, 5  ;;  %s256_s28 = scalar_lea.sflag (!%p1000_p3), [#allocation3], %s1019_s1 }
  0x29   : > { %s259_s16 = scalar_lea.vmem (!%p1000_p3), [#allocation2], %s1022_s20 }
  0x2a   : > { %854 = dma.done.wait (%p964_p8), %s256_s28, 512  }
  0x2b   : > { %856 = vsyncadd (%p964_p8), %s256_s28, 4294966784  ;;  %s265_s14 = sand.u32 1, %s944_s18   ;;  %s269_s26 = scalar_lea.vmem [#allocation5], %s1022_s20 }
  0x2c   : > { %s266_s17 = scalar_lea.sflag [#allocation6], %s265_s14 }
  0x2d   : > { %858 = dma.done.wait (%p964_p8), %s266_s17, 1024  }
  0x2e   : > { %860 = vsyncadd (%p964_p8), %s266_s17, 4294966272  ;;  %vm329_vm0 = vcmask 261120   ;;  %v323_v0 = vld [vmem:[%s269_s26 + $0x10] sm:$0xff]  ;;  %v324_v1 = vld [vmem:[%s269_s26 + $0x18] sm:$0xff]  ;;  %s634_s18 = sshll.u32 %s879_s15, 5  ;;  %s279_s24 = scalar_lea.vmem [#allocation7], %s1022_s20 }
  0x2f   : > { %v319_v2 = vld [vmem:[%s259_s16 + $0x10] sm:$0xff]  ;;  %622 = vmatpush.xpose.msk.msra.mxu2 %vm329_vm0, %v323_v0  ;;  %624 = vmatpush.xpose.msk.msra.mxu3 %vm329_vm0, %v324_v1  ;;  %v320_v3 = vld [vmem:[%s259_s16 + $0x18] sm:$0xff]  ;;  %v321_v4 = vld [vmem:[%s269_s26] sm:$0xff]  ;;  %vm434_vm1 = vcmask 64512   ;;  %s454_s4 = scalar_lea.hbm %s1091_s3, %s634_s18  ;;  %s312_s19 = scalar_lea.vmem [#allocation8], %s1022_s20 }
  0x30   : > { %v322_v5 = vld [vmem:[%s269_s26 + $0x8] sm:$0xff]  ;;  %618 = vmatpush.xpose.msk.msra.mxu0 %vm329_vm0, %v321_v4  ;;  %v317_v6 = vld [vmem:[%s259_s16] sm:$0xff]  ;;  %s455_s21 = sshll.u32 %s312_s19, 4  ;;  %v327_v14 = vld [vmem:[%s279_s24 + $0x10] sm:$0xff]  ;;  %s457_s15 = sshll.u32 %s454_s4, 4  ;;  %s456_s21 = int_to_ptr.vmem [resolvable:$true] %s455_s21  ;;  %s458_s15 = int_to_ptr.hbm [resolvable:$true] %s457_s15 }
  0x31   : > { %620 = vmatpush.xpose.msk.msra.mxu1 %vm329_vm0, %v322_v5  ;;  %v318_v7 = vld [vmem:[%s259_s16 + $0x8] sm:$0xff]  ;;  %v325_v8 = vld [vmem:[%s279_s24] sm:$0xff]  ;;  %v328_v15 = vld [vmem:[%s279_s24 + $0x18] sm:$0xff]  ;;  %s440_s22 = scalar_lea.sflag [#allocation4], %s1019_s1  ;;  %s815_s23 = sshra.s32 %s458_s15, 4  ;;  %s816_s23 = int_to_ptr.hbm [resolvable:$true] %s815_s23 }
  0x32   : > { %623 = vmatmul.msk.f32.vlgmr.msra.gmra.mxu2 %vm329_vm0, %v319_v2  ;;  %625 = vmatmul.msk.f32.vlgmr.msra.gmra.mxu3 %vm329_vm0, %v320_v3  ;;  %v326_v9 = vld [vmem:[%s279_s24 + $0x8] sm:$0xff]  ;;  %s817_s6 = scalar_lea.hbm %s816_s23, 32  ;;  %s821_s10 = scalar_lea.hbm %s1091_s3, 64 }
  0x33   : > { %619 = vmatmul.msk.f32.vlgmr.msra.gmra.mxu0 %vm329_vm0, %v317_v6  ;;  %p818_p4 = scmp.ne.s32.totalorder %s816_s23, %s817_s6  ;;  %p822_p7 = scmp.lt.s32.totalorder %s816_s23, %s1091_s3 }
  0x34   : > { %621 = vmatmul.msk.f32.vlgmr.msra.gmra.mxu1 %vm329_vm0, %v318_v7  ;;  %p823_p8 = scmp.lt.s32.totalorder %s821_s10, %s817_s6 }
  0x35   : > { %p819_p5 = pnand %p818_p4, %p968_p9 }
  0x36   : > { %p824_p10 = por %p823_p8, %p822_p7 }
  0x37   : > { %p820_p6 = pneg %p819_p5 }
  0x39   : > { %p825_p13 = pnand %p824_p10, %p820_p6 }
  0xb0   : > { %v353_v10 = vpop.f32.mrf.mxu0 }
  0xb1   : > { %v379_v11 = vpop.f32.mrf.mxu1  ;;  %v354_v12 = vadd.f32 %v353_v10, %v325_v8 }
  0xb2   : > { %v380_v13 = vadd.f32 %v379_v11, %v326_v9 }
  0xb3   : > { %435 = vst.msk [vmem:[%s312_s19] sm:$0xff] %vm434_vm1, %v354_v12 }
  0xb4   : > { %436 = vst.msk [vmem:[%s312_s19 + $0x8] sm:$0xff] %vm434_vm1, %v380_v13 }
  0xb5   : > { %v405_v16 = vpop.f32.mrf.mxu2  ;;  %v431_v17 = vpop.f32.mrf.mxu3 }
  0xb6   : > { %v406_v18 = vadd.f32 %v405_v16, %v327_v14  ;;  %v432_v19 = vadd.f32 %v431_v17, %v328_v15 }
  0xb8   : > { %437 = vst.msk [vmem:[%s312_s19 + $0x10] sm:$0xff] %vm434_vm1, %v406_v18 }
  0xb9   : > { %438 = vst.msk [vmem:[%s312_s19 + $0x18] sm:$0xff] %vm434_vm1, %v432_v19 }
  0xba   : > { %828 = shalt.err (!%p825_p13)
}
  0xbb   : > { %s891_s11 = smov 128   ;;  %s892_s1 = smov 8  }
  0xbc   : > { %641 = dma.vmem_to_hbm [thread:$0]  (%p968_p9), %s456_s21, 512, %s458_s15, %s440_s22, %s891_s11, %s891_s11, %s892_s1  }
  0xbd PF: > { %s1110_s20 = sld [smem:[#allocation14_spill]]  ;;  %s472_s28 = sand.u32 1, %s867_s12  }
  0xbe   : > { %p654_p0 = pnand %p603_p12, %p975_p11  ;;  %s473_s16 = scalar_lea.sflag [#allocation4], %s472_s28 }
  0xc0   : > { %p655_p1 = pneg %p654_p0 }
  0xc2   : > { %862 = dma.done.wait (%p655_p1), %s473_s16, 512  }
  0xc3   : > { %864 = vsyncadd (%p655_p1), %s473_s16, 4294966784  ;;  %s22_s17 = sadd.s32 1, %s1110_s20   ;;  %s1111_s14 = sld [smem:[#allocation12_spill]] }
  0xc4   : > { %p19_p2 = scmp.ge.s32.totalorder %s22_s17, 4   ;;  %s1112_s26 = sld [smem:[#allocation16_spill]] }
  0xc5   : > { %s1113_s15 = sld [smem:[#allocation13_spill]]  ;;  %s1115_s12 = smov %s871_s13 }
  0xc6   : > { %s1114_s16 = sld [smem:[#allocation15_spill]]  ;;  %21 = sbr.rel (!%p19_p2) target bundleno = 10 (0xa), region = 101 }
  0xc9   : > { %s1116_s13 = smov %s1111_s14 }
  0xca   : > { %s1117_s14 = smov %s1112_s26 }
  0xcb   :  { %479 = vsyncpa [#allocation3], 1 }
  0xcc   :  { %481 = vsyncpa [#allocation3 + $0x1], 1 }
  0xcd   :  { %482 = vsyncpa [#allocation6], 1 }
  0xce   :  { %484 = vsyncpa [#allocation6 + $0x1], 1 }
  0xcf   :  { %485 = vsyncpa [#allocation4], 1 }
  0xd0   :  { %487 = vsyncpa [#allocation4 + $0x1], 1 }

</bundles_post_ra>
